<compile_context>
chip_gen: v5e
topology: v5e:2x2
jax: 0.10.0
libtpu: 0.0.40
codegen_flags: <defaults>
</compile_context>

<pallas_src>
import math

import jax
import jax.numpy as jnp
from jax.experimental import pallas as pl
from jax.experimental.pallas import tpu as pltpu


# ---------------------------------------------------------------------------
# Fused GCN layer kernel (one row tile = bpt whole samples):
#     out_tile = ReLU( adj_blockdiag @ (x_tile @ W) + b )
# ---------------------------------------------------------------------------
def _gcn_fused_kernel(adj_ref, x_ref, w_ref, b_ref, o_ref):
    # adj_ref: (tm, tm)  block-diagonal kron(eye(bpt), adj)  (f32 or bf16)
    # x_ref:   (tm, Fin)                                     (f32 or bf16)
    # w_ref:   (Fin, Fp)                                     (f32 or bf16)
    # b_ref:   (1, Fp)   f32
    # o_ref:   (tm, Fp)  f32
    #
    # Feature projection: ONE wide MXU matmul with f32 accumulation.
    xw = jnp.dot(x_ref[...], w_ref[...], preferred_element_type=jnp.float32)

    # Graph propagation for all samples in this tile at once via the
    # block-diagonal adjacency: ONE (tm,tm)x(tm,Fp) MXU matmul instead of
    # bpt tiny (N,N)x(N,Fp) ones.
    xw = xw.astype(x_ref.dtype)  # no-op for f32; re-narrows for the bf16 path
    h = jnp.dot(adj_ref[...], xw, preferred_element_type=jnp.float32)

    # Single bias broadcast + ReLU + one lane-dense store of the whole tile.
    o_ref[...] = jnp.maximum(h + b_ref[...], 0.0)


def gcn_layer(x, adj, w, b, *, use_bf16_matmul=False, max_rows_per_tile=512):
    """ReLU((adj @ x) @ w + b), same semantics as GCN_Layer.forward.

    x:   (B, N, Fin) float32   -- node signals (Fin = T*D in the reference)
    adj: (N, N)      float32
    w:   (Fin, Fout) float32   -- nn.Linear weight (already transposed)
    b:   (Fout,)     float32
    returns (B, N, Fout) float32
    """
    B, N, Fin = x.shape
    Fout = w.shape[1]
    assert adj.shape == (N, N)
    assert N % 8 == 0, "N should be a multiple of 8 for aligned sublane tiles"

    # Pad the filter dim up to a multiple of 128 so kernel stores are
    # lane-dense; padded columns are exactly zero (ReLU(0 + 0) = 0).
    f_pad = ((Fout + 127) // 128) * 128
    if f_pad != Fout:
        w_p = jnp.pad(w, ((0, 0), (0, f_pad - Fout)))
        b_p = jnp.pad(b, (0, f_pad - Fout))
    else:
        w_p, b_p = w, b
    b2 = b_p.reshape(1, f_pad).astype(jnp.float32)

    # Row tile = bpt whole samples (bpt divides B).  Bounds VMEM (v7x: 64 MiB)
    # and provides a "parallel" grid axis for multi-TensorCore chips.
    bpt = 1
    for k in range(1, B + 1):
        if B % k == 0 and k * N <= max_rows_per_tile:
            bpt = k
    tm = bpt * N
    grid = (B // bpt,)

    # Block-diagonal adjacency for one tile.  Every grid step uses the SAME
    # block (index_map -> (0,0)), so it is DMA'd once and stays VMEM resident.
    # TODO(synk): for very large B*N where even a (tm,tm) block-diag tile is
    # wasteful, switch to stacking the batch into the lane axis instead.
    adj_tile = jnp.kron(jnp.eye(bpt, dtype=adj.dtype), adj)

    # Flatten batch*node rows (layout-preserving) -> one wide projection.
    x2d = x.reshape(B * N, Fin)

    # bf16 casts at trace time (wrapper), not in the kernel body.
    if use_bf16_matmul:
        x2d = x2d.astype(jnp.bfloat16)
        adj_tile = adj_tile.astype(jnp.bfloat16)
        w_p = w_p.astype(jnp.bfloat16)

    esize = 2 if use_bf16_matmul else 4
    cost = pl.CostEstimate(
        flops=2 * B * N * Fin * f_pad + 2 * (B // bpt) * tm * tm * f_pad,
        transcendentals=0,
        bytes_accessed=(B * N * Fin * esize      # x2d
                        + tm * tm * esize        # adj_tile (resident)
                        + Fin * f_pad * esize    # W (resident)
                        + f_pad * 4              # bias (resident)
                        + B * N * f_pad * 4))    # output

    out2d = pl.pallas_call(
        _gcn_fused_kernel,
        out_shape=jax.ShapeDtypeStruct((B * N, f_pad), jnp.float32),
        grid=grid,
        in_specs=[
            pl.BlockSpec((tm, tm), lambda i: (0, 0)),       # adj (reused)
            pl.BlockSpec((tm, Fin), lambda i: (i, 0)),      # x rows, tile i
            pl.BlockSpec((Fin, f_pad), lambda i: (0, 0)),   # W (reused)
            pl.BlockSpec((1, f_pad), lambda i: (0, 0)),     # bias (reused)
        ],
        out_specs=pl.BlockSpec((tm, f_pad), lambda i: (i, 0)),
        compiler_params=pltpu.CompilerParams(
            dimension_semantics=("parallel",)),
        cost_estimate=cost,
    )(adj_tile, x2d, w_p, b2)

    # TODO(synk): a consumer that accepts the 128-padded filter layout could
    # take out2d directly and skip this slice-copy.
    out = out2d[:, :Fout] if f_pad != Fout else out2d
    return out.reshape(B, N, Fout)


# ---------------------------------------------------------------------------
if __name__ == "__main__":
    key = jax.random.PRNGKey(0)
    k_x, k_adj, k_w, k_b = jax.random.split(key, 4)

    batch_size, N = 4, 32
    T, D = 2, 16
    Fin = T * D            # node feature dim (T*D per the reference docstring)
    Fout = 64              # num_of_filter

    x = jax.random.normal(k_x, (batch_size, N, Fin), jnp.float32)

    # Row-normalized adjacency with self loops (stands in for the np.array adj).
    a = (jax.random.uniform(k_adj, (N, N), jnp.float32) > 0.7).astype(jnp.float32)
    a = a + jnp.eye(N, dtype=jnp.float32)
    adj = a / jnp.sum(a, axis=-1, keepdims=True)

    # nn.Linear default init: U(-1/sqrt(fan_in), 1/sqrt(fan_in)).
    bound = 1.0 / math.sqrt(Fin)
    w = jax.random.uniform(k_w, (Fin, Fout), jnp.float32, -bound, bound)
    b = jax.random.uniform(k_b, (Fout,), jnp.float32, -bound, bound)

    gcn = jax.jit(gcn_layer)
    out = jax.block_until_ready(gcn(x, adj, w, b))

    # Plain-JAX reference in the exact PyTorch op order:
    #   ReLU(Linear(bmm(adj.repeat(B,1,1), x)))
    h_ref = jnp.einsum('nm,bmf->bnf', adj, x)
    ref = jnp.maximum(jnp.einsum('bnf,fo->bno', h_ref, w) + b, 0.0)

    assert out.shape == (batch_size, N, Fout), out.shape
    assert bool(jnp.all(jnp.isfinite(out)))
    assert bool(jnp.allclose(out, ref, rtol=1e-4, atol=1e-4)), float(
        jnp.max(jnp.abs(out - ref)))
    print("KERNEL_OK")
</pallas_src>

<mosaic_0001>
module attributes {stable_mosaic.version = 11 : i64} {
  func.func @_gcn_fused_kernel(%arg0: i32, %arg1: memref<128x128xf32, #tpu.memory_space<vmem>>, %arg2: memref<128x32xf32, #tpu.memory_space<vmem>>, %arg3: memref<32x128xf32, #tpu.memory_space<vmem>>, %arg4: memref<1x128xf32, #tpu.memory_space<vmem>>, %arg5: memref<128x128xf32, #tpu.memory_space<vmem>>) attributes {dimension_semantics = [#tpu.dimension_semantics<parallel>], iteration_bounds = array<i64: 1>, scalar_prefetch = 0 : i64, scratch_operands = 0 : i64, tpu.core_type = #tpu.core_type<tc>, window_params = [{pipeline_mode = #tpu.pipeline_mode<synchronous>, transform_indices = @transform_0, window_bounds = array<i64: 128, 128>}, {transform_indices = @transform_1, window_bounds = array<i64: 128, 32>}, {pipeline_mode = #tpu.pipeline_mode<synchronous>, transform_indices = @transform_2, window_bounds = array<i64: 32, 128>}, {pipeline_mode = #tpu.pipeline_mode<synchronous>, transform_indices = @transform_3, window_bounds = array<i64: 1, 128>}, {transform_indices = @transform_4, window_bounds = array<i64: 128, 128>}]} {
    %c0 = arith.constant 0 : index
    %c0_0 = arith.constant 0 : index
    %0 = vector.load %arg2[%c0, %c0_0] : memref<128x32xf32, #tpu.memory_space<vmem>>, vector<128x32xf32>
    %c0_1 = arith.constant 0 : index
    %c0_2 = arith.constant 0 : index
    %1 = vector.load %arg3[%c0_1, %c0_2] : memref<32x128xf32, #tpu.memory_space<vmem>>, vector<32x128xf32>
    %cst = arith.constant dense<0.000000e+00> : vector<128x128xf32>
    %2 = tpu.matmul %0, %1, %cst {dimension_numbers = #tpu.dot_dimension_numbers<[1], [0], [0], [1], [0, 0, 1, 1], [], []>} : vector<128x32xf32>, vector<32x128xf32>, vector<128x128xf32> -> vector<128x128xf32>
    %c0_3 = arith.constant 0 : index
    %c0_4 = arith.constant 0 : index
    %3 = vector.load %arg1[%c0_3, %c0_4] : memref<128x128xf32, #tpu.memory_space<vmem>>, vector<128x128xf32>
    %cst_5 = arith.constant dense<0.000000e+00> : vector<128x128xf32>
    %4 = tpu.matmul %3, %2, %cst_5 {dimension_numbers = #tpu.dot_dimension_numbers<[1], [0], [0], [1], [0, 0, 1, 1], [], []>} : vector<128x128xf32>, vector<128x128xf32>, vector<128x128xf32> -> vector<128x128xf32>
    %c0_6 = arith.constant 0 : index
    %c0_7 = arith.constant 0 : index
    %5 = vector.load %arg4[%c0_6, %c0_7] : memref<1x128xf32, #tpu.memory_space<vmem>>, vector<1x128xf32>
    %6 = vector.broadcast %5 : vector<1x128xf32> to vector<128x128xf32>
    %7 = arith.addf %4, %6 : vector<128x128xf32>
    %cst_8 = arith.constant 0.000000e+00 : f32
    %8 = vector.broadcast %cst_8 : f32 to vector<128x128xf32>
    %9 = arith.maximumf %7, %8 : vector<128x128xf32>
    %c0_9 = arith.constant 0 : index
    %c0_10 = arith.constant 0 : index
    %10 = vector.load %arg5[%c0_9, %c0_10] : memref<128x128xf32, #tpu.memory_space<vmem>>, vector<128x128xf32>
    tpu.vector_store %arg5[%c0_9, %c0_10], %9 {strides = array<i32>} : memref<128x128xf32, #tpu.memory_space<vmem>>, vector<128x128xf32>,
    return
  }
  func.func @transform_0(%arg0: i32) -> (i32, i32) {
    %c0_i32 = arith.constant 0 : i32
    %c0_i32_0 = arith.constant 0 : i32
    %c0_i32_1 = arith.constant 0 : i32
    return %c0_i32, %c0_i32_0 : i32, i32
  }
  func.func @transform_1(%arg0: i32) -> (i32, i32) {
    %c0_i32 = arith.constant 0 : i32
    %c0_i32_0 = arith.constant 0 : i32
    return %arg0, %c0_i32 : i32, i32
  }
  func.func @transform_2(%arg0: i32) -> (i32, i32) {
    %c0_i32 = arith.constant 0 : i32
    %c0_i32_0 = arith.constant 0 : i32
    %c0_i32_1 = arith.constant 0 : i32
    return %c0_i32, %c0_i32_0 : i32, i32
  }
  func.func @transform_3(%arg0: i32) -> (i32, i32) {
    %c0_i32 = arith.constant 0 : i32
    %c0_i32_0 = arith.constant 0 : i32
    %c0_i32_1 = arith.constant 0 : i32
    return %c0_i32, %c0_i32_0 : i32, i32
  }
  func.func @transform_4(%arg0: i32) -> (i32, i32) {
    %c0_i32 = arith.constant 0 : i32
    %c0_i32_0 = arith.constant 0 : i32
    return %arg0, %c0_i32 : i32, i32
  }
}

</mosaic_0001>

<bundles_post_ra>
// kernel: gcn_layer.1
= control target key start
LH: loop header
LB: loop body
LE: loop exit
PB: predicated region body
PF: predicated region fallthrough
CT: control target
= control target key end

     0   :  { %s550_s0 = inlined_call_operand.vmem [shape: f32[128,128], index: 0, kind: input, shape index: {}]   ;;  %s551_s1 = inlined_call_operand.vmem [shape: f32[128,32], index: 1, kind: input, shape index: {}]   ;;  %s552_s2 = inlined_call_operand.vmem [shape: f32[32,128], index: 2, kind: input, shape index: {}]   ;;  %s553_s3 = inlined_call_operand.vmem [shape: f32[1,128], index: 3, kind: input, shape index: {}]   ;;  %s554_s4 = inlined_call_operand.hbm [shape: f32[128,128], index: 4, kind: output, shape index: {}]  }
   0x1   :  { %v37_v0 = vld [vmem:[%s552_s2 + $0x18] sm:$0xff]  ;;  %v36_v1 = vld [vmem:[%s552_s2 + $0x10] sm:$0xff]  ;;  %v35_v2 = vld [vmem:[%s552_s2 + $0x8] sm:$0xff] }
   0x2   :  { %99 = vmatpush.msra.mxu0 %v37_v0  ;;  %303 = vmatpush.msra.mxu3 %v37_v0  ;;  %v34_v3 = vld [vmem:[%s552_s2] sm:$0xff] }
   0x4   :  { %100 = vmatpush.msra.mxu0 %v36_v1  ;;  %304 = vmatpush.msra.mxu3 %v36_v1 }
   0x5   :  { %9 = vsyncpa [#allocation3], 0  ;;  %v18_v4 = vld [vmem:[%s551_s1] sm:$0xff]  ;;  %vm38_vm0 = vcmask 261120   ;;  %v28_v5 = vld [vmem:[%s551_s1 + $0x50] sm:$0xff]  ;;  %s275_s8 = sshll.u32 %s554_s4, 4  ;;  %s276_s8 = int_to_ptr.hbm [resolvable:$true] %s275_s8 }
   0x6   :  { %101 = vmatpush.msra.mxu0 %v35_v2  ;;  %305 = vmatpush.msra.mxu3 %v35_v2  ;;  %v19_v6 = vld [vmem:[%s551_s1 + $0x8] sm:$0xff]  ;;  %v29_v7 = vld [vmem:[%s551_s1 + $0x58] sm:$0xff]  ;;  %v20_v8 = vld [vmem:[%s551_s1 + $0x10] sm:$0xff]  ;;  %s370_s9 = smov 128   ;;  %s371_s10 = smov 8  }
   0x7   :  { %v30_v9 = vld [vmem:[%s551_s1 + $0x60] sm:$0xff]  ;;  %v21_v10 = vld [vmem:[%s551_s1 + $0x18] sm:$0xff]  ;;  %v31_v11 = vld [vmem:[%s551_s1 + $0x68] sm:$0xff] }
   0x8   :  { %102 = vmatpush.msra.mxu0 %v34_v3  ;;  %306 = vmatpush.msra.mxu3 %v34_v3  ;;  %v22_v12 = vld [vmem:[%s551_s1 + $0x20] sm:$0xff]  ;;  %v32_v13 = vld [vmem:[%s551_s1 + $0x70] sm:$0xff]  ;;  %v23_v14 = vld [vmem:[%s551_s1 + $0x28] sm:$0xff] }
   0x9   :  { %287 = vmatmul.msk.f32.vlgmr.msra.gmra.mxu0 %vm38_vm0, %v18_v4  ;;  %297 = vmatmul.msk.f32.vlgmr.msra.gmra.mxu3 %vm38_vm0, %v28_v5  ;;  %v33_v15 = vld [vmem:[%s551_s1 + $0x78] sm:$0xff]  ;;  %v24_v16 = vld [vmem:[%s551_s1 + $0x30] sm:$0xff]  ;;  %v26_v18 = vld [vmem:[%s551_s1 + $0x40] sm:$0xff] }
   0xa   :  { %v25_v17 = vld [vmem:[%s551_s1 + $0x38] sm:$0xff]  ;;  %v27_v19 = vld [vmem:[%s551_s1 + $0x48] sm:$0xff]  ;;  %v152_v37 = vld [vmem:[%s550_s0] sm:$0xff] }
   0xb   :  { %v159_v36 = vld [vmem:[%s550_s0 + $0x38] sm:$0xff]  ;;  %v160_v38 = vld [vmem:[%s550_s0 + $0x40] sm:$0xff]  ;;  %v153_v39 = vld [vmem:[%s550_s0 + $0x8] sm:$0xff] }
   0xc   :  { %v166_v40 = vld [vmem:[%s550_s0 + $0x70] sm:$0xff]  ;;  %v161_v41 = vld [vmem:[%s550_s0 + $0x48] sm:$0xff]  ;;  %v167_v43 = vld [vmem:[%s550_s0 + $0x78] sm:$0xff] }
   0xd   :  { %v154_v42 = vld [vmem:[%s550_s0 + $0x10] sm:$0xff]  ;;  %v155_v45 = vld [vmem:[%s550_s0 + $0x18] sm:$0xff]  ;;  %v156_v47 = vld [vmem:[%s550_s0 + $0x20] sm:$0xff] }
   0xe   :  { %v162_v44 = vld [vmem:[%s550_s0 + $0x50] sm:$0xff]  ;;  %v163_v46 = vld [vmem:[%s550_s0 + $0x58] sm:$0xff]  ;;  %v164_v48 = vld [vmem:[%s550_s0 + $0x60] sm:$0xff] }
   0xf   :  { %v157_v49 = vld [vmem:[%s550_s0 + $0x28] sm:$0xff]  ;;  %v158_v51 = vld [vmem:[%s550_s0 + $0x30] sm:$0xff]  ;;  %v529_v52 = vld [vmem:[%s553_s3] ss:$0 sm:$0xff] }
  0x10   :  { %v165_v50 = vld [vmem:[%s550_s0 + $0x68] sm:$0xff]  ;;  %s369_s0 = smov [#allocation2]  }
  0x11   :  { %288 = vmatmul.msk.f32.gmra.mxu0 %vm38_vm0, %v19_v6  ;;  %298 = vmatmul.msk.f32.gmra.mxu3 %vm38_vm0, %v29_v7  ;;  %s273_s3 = sshll.u32 %s369_s0, 4  ;;  %s274_s3 = int_to_ptr.vmem [resolvable:$true] %s273_s3 }
  0x19   :  { %289 = vmatmul.msk.f32.gmra.mxu0 %vm38_vm0, %v20_v8  ;;  %299 = vmatmul.msk.f32.gmra.mxu3 %vm38_vm0, %v30_v9 }
  0x21   :  { %290 = vmatmul.msk.f32.gmra.mxu0 %vm38_vm0, %v21_v10  ;;  %300 = vmatmul.msk.f32.gmra.mxu3 %vm38_vm0, %v31_v11 }
  0x29   :  { %291 = vmatmul.msk.f32.gmra.mxu0 %vm38_vm0, %v22_v12  ;;  %301 = vmatmul.msk.f32.gmra.mxu3 %vm38_vm0, %v32_v13 }
  0x31   :  { %292 = vmatmul.msk.f32.gmra.mxu0 %vm38_vm0, %v23_v14  ;;  %302 = vmatmul.msk.f32.gmra.mxu3 %vm38_vm0, %v33_v15 }
  0x39   :  { %293 = vmatmul.msk.f32.gmra.mxu0 %vm38_vm0, %v24_v16 }
  0x41   :  { %294 = vmatmul.msk.f32.gmra.mxu0 %vm38_vm0, %v25_v17 }
  0x49   :  { %295 = vmatmul.msk.f32.gmra.mxu0 %vm38_vm0, %v26_v18 }
  0x51   :  { %296 = vmatmul.msk.f32.gmra.mxu0 %vm38_vm0, %v27_v19 }
  0x86   :  { %v473_v20 = vpop.f32.mrf.mxu0 }
  0x8c   :  { %v134_v21 = vpop.f32.mrf.mxu3 }
  0x8e   :  { %v107_v22 = vpop.f32.mrf.mxu0 }
  0x94   :  { %v137_v23 = vpop.f32.mrf.mxu3 }
  0x96   :  { %v110_v24 = vpop.f32.mrf.mxu0 }
  0x9c   :  { %v140_v25 = vpop.f32.mrf.mxu3 }
  0x9e   :  { %v113_v26 = vpop.f32.mrf.mxu0 }
  0xa4   :  { %v143_v27 = vpop.f32.mrf.mxu3 }
  0xa6   :  { %v116_v28 = vpop.f32.mrf.mxu0 }
  0xac   :  { %v146_v29 = vpop.f32.mrf.mxu3 }
  0xae   :  { %v119_v30 = vpop.f32.mrf.mxu0 }
  0xb4   :  { %v149_v31 = vpop.f32.mrf.mxu3 }
  0xb5   :  { %172 = vmatpush.msra.mxu1 %v149_v31  ;;  %307 = vmatpush.msra.mxu2 %v149_v31 }
  0xb6   :  { %308 = vmatpush.msrb.mxu3 %v149_v31  ;;  %v122_v32 = vpop.f32.mrf.mxu0 }
  0xb7   :  { %173 = vmatpush.msra.mxu1 %v146_v29  ;;  %309 = vmatpush.msra.mxu2 %v146_v29 }
  0xb8   :  { %310 = vmatpush.msrb.mxu3 %v146_v29 }
  0xb9   :  { %174 = vmatpush.msra.mxu1 %v143_v27  ;;  %311 = vmatpush.msra.mxu2 %v143_v27 }
  0xba   :  { %312 = vmatpush.msrb.mxu3 %v143_v27 }
  0xbb   :  { %175 = vmatpush.msra.mxu1 %v140_v25  ;;  %313 = vmatpush.msra.mxu2 %v140_v25 }
  0xbc   :  { %314 = vmatpush.msrb.mxu3 %v140_v25 }
  0xbd   :  { %176 = vmatpush.msra.mxu1 %v137_v23  ;;  %315 = vmatpush.msra.mxu2 %v137_v23 }
  0xbe   :  { %316 = vmatpush.msrb.mxu3 %v137_v23  ;;  %v125_v33 = vpop.f32.mrf.mxu0 }
  0xbf   :  { %177 = vmatpush.msra.mxu1 %v134_v21  ;;  %317 = vmatpush.msra.mxu2 %v134_v21 }
  0xc0   :  { %318 = vmatpush.msrb.mxu3 %v134_v21 }
  0xc6   :  { %v128_v34 = vpop.f32.mrf.mxu0 }
  0xce   :  { %v131_v35 = vpop.f32.mrf.mxu0 }
  0xcf   :  { %178 = vmatpush.msra.mxu1 %v131_v35  ;;  %319 = vmatpush.msra.mxu2 %v131_v35 }
  0xd0   :  { %320 = vmatpush.msrb.mxu3 %v131_v35 }
  0xd1   :  { %179 = vmatpush.msra.mxu1 %v128_v34  ;;  %321 = vmatpush.msra.mxu2 %v128_v34 }
  0xd2   :  { %322 = vmatpush.msrb.mxu3 %v128_v34 }
  0xd3   :  { %180 = vmatpush.msra.mxu1 %v125_v33  ;;  %323 = vmatpush.msra.mxu2 %v125_v33 }
  0xd4   :  { %324 = vmatpush.msrb.mxu3 %v125_v33 }
  0xd5   :  { %181 = vmatpush.msra.mxu1 %v122_v32  ;;  %325 = vmatpush.msra.mxu2 %v122_v32 }
  0xd6   :  { %326 = vmatpush.msrb.mxu3 %v122_v32 }
  0xd7   :  { %182 = vmatpush.msra.mxu1 %v119_v30  ;;  %327 = vmatpush.msra.mxu2 %v119_v30 }
  0xd8   :  { %328 = vmatpush.msrb.mxu3 %v119_v30 }
  0xd9   :  { %183 = vmatpush.msra.mxu1 %v116_v28  ;;  %329 = vmatpush.msra.mxu2 %v116_v28 }
  0xda   :  { %330 = vmatpush.msrb.mxu3 %v116_v28 }
  0xdb   :  { %184 = vmatpush.msra.mxu1 %v113_v26  ;;  %331 = vmatpush.msra.mxu2 %v113_v26 }
  0xdc   :  { %332 = vmatpush.msrb.mxu3 %v113_v26 }
  0xdd   :  { %185 = vmatpush.msra.mxu1 %v110_v24  ;;  %333 = vmatpush.msra.mxu2 %v110_v24 }
  0xde   :  { %334 = vmatpush.msrb.mxu3 %v110_v24 }
  0xdf   :  { %186 = vmatpush.msra.mxu1 %v107_v22  ;;  %335 = vmatpush.msra.mxu2 %v107_v22 }
  0xe0   :  { %336 = vmatpush.msrb.mxu3 %v107_v22 }
  0xe1   :  { %187 = vmatpush.msra.mxu1 %v473_v20  ;;  %337 = vmatpush.msra.mxu2 %v473_v20 }
  0xe2   :  { %338 = vmatpush.msrb.mxu3 %v473_v20  ;;  %209 = vmatmul.f32.vlgmr.msra.gmra.mxu2 %v159_v36 }
  0xe3   :  { %188 = vmatmul.f32.vlgmr.msra.gmra.mxu1 %v152_v37  ;;  %230 = vmatmul.f32.vlgmr.msrb.gmra.mxu3 %v166_v40 }
  0xea   :  { %212 = vmatmul.f32.gmra.mxu2 %v160_v38 }
  0xeb   :  { %191 = vmatmul.f32.gmra.mxu1 %v153_v39  ;;  %233 = vmatmul.f32.gmra.mxu3 %v167_v43 }
  0xf2   :  { %215 = vmatmul.f32.gmra.mxu2 %v161_v41 }
  0xf3   :  { %194 = vmatmul.f32.gmra.mxu1 %v154_v42 }
  0xfa   :  { %218 = vmatmul.f32.gmra.mxu2 %v162_v44 }
  0xfb   :  { %197 = vmatmul.f32.gmra.mxu1 %v155_v45 }
 0x102   :  { %221 = vmatmul.f32.gmra.mxu2 %v163_v46 }
 0x103   :  { %200 = vmatmul.f32.gmra.mxu1 %v156_v47 }
 0x10a   :  { %224 = vmatmul.f32.gmra.mxu2 %v164_v48 }
 0x10b   :  { %203 = vmatmul.f32.gmra.mxu1 %v157_v49 }
 0x112   :  { %227 = vmatmul.f32.gmra.mxu2 %v165_v50 }
 0x113   :  { %206 = vmatmul.f32.gmra.mxu1 %v158_v51 }
 0x160   :  { %v189_v53 = vpop.f32.mrf.mxu1 }
 0x161   :  { %v190_v54 = vadd.f32 %v529_v52, %v189_v53 }
 0x163   :  { %v237_v55 = vmax.f32 %v190_v54, 0.0 }
 0x165   :  { %253 = vst [vmem:[#allocation2] sm:$0xff] %v237_v55  ;;  %v210_v56 = vpop.f32.mrf.mxu2 }
 0x166   :  { %v211_v57 = vadd.f32 %v529_v52, %v210_v56  ;;  %v231_v0 = vpop.f32.mrf.mxu3 }
 0x167   :  { %v232_v1 = vadd.f32 %v529_v52, %v231_v0 }
 0x168   :  { %v244_v58 = vmax.f32 %v211_v57, 0.0  ;;  %v192_v59 = vpop.f32.mrf.mxu1 }
 0x169   :  { %v193_v60 = vadd.f32 %v529_v52, %v192_v59  ;;  %v251_v5 = vmax.f32 %v232_v1, 0.0 }
 0x16a   :  { %260 = vst [vmem:[#allocation2 + $0x38] sm:$0xff] %v244_v58 }
 0x16b   :  { %v238_v61 = vmax.f32 %v193_v60, 0.0  ;;  %267 = vst [vmem:[#allocation2 + $0x70] sm:$0xff] %v251_v5 }
 0x16d   :  { %254 = vst [vmem:[#allocation2 + $0x8] sm:$0xff] %v238_v61  ;;  %v213_v62 = vpop.f32.mrf.mxu2 }
 0x16e   :  { %v214_v63 = vadd.f32 %v529_v52, %v213_v62  ;;  %v234_v9 = vpop.f32.mrf.mxu3 }
 0x16f   :  { %v235_v10 = vadd.f32 %v529_v52, %v234_v9 }
 0x170   :  { %v245_v2 = vmax.f32 %v214_v63, 0.0  ;;  %v195_v3 = vpop.f32.mrf.mxu1 }
 0x171   :  { %v196_v4 = vadd.f32 %v529_v52, %v195_v3  ;;  %v252_v14 = vmax.f32 %v235_v10, 0.0 }
 0x172   :  { %261 = vst [vmem:[#allocation2 + $0x40] sm:$0xff] %v245_v2 }
 0x173   :  { %v239_v6 = vmax.f32 %v196_v4, 0.0  ;;  %268 = vst [vmem:[#allocation2 + $0x78] sm:$0xff] %v252_v14 }
 0x175   :  { %255 = vst [vmem:[#allocation2 + $0x10] sm:$0xff] %v239_v6  ;;  %v216_v7 = vpop.f32.mrf.mxu2 }
 0x176   :  { %v217_v8 = vadd.f32 %v529_v52, %v216_v7 }
 0x178   :  { %v246_v11 = vmax.f32 %v217_v8, 0.0  ;;  %v198_v12 = vpop.f32.mrf.mxu1 }
 0x179   :  { %v199_v13 = vadd.f32 %v529_v52, %v198_v12 }
 0x17a   :  { %262 = vst [vmem:[#allocation2 + $0x48] sm:$0xff] %v246_v11 }
 0x17b   :  { %v240_v15 = vmax.f32 %v199_v13, 0.0 }
 0x17d   :  { %256 = vst [vmem:[#allocation2 + $0x18] sm:$0xff] %v240_v15  ;;  %v219_v16 = vpop.f32.mrf.mxu2 }
 0x17e   :  { %v220_v17 = vadd.f32 %v529_v52, %v219_v16 }
 0x180   :  { %v247_v18 = vmax.f32 %v220_v17, 0.0  ;;  %v201_v19 = vpop.f32.mrf.mxu1 }
 0x181   :  { %v202_v20 = vadd.f32 %v529_v52, %v201_v19 }
 0x182   :  { %263 = vst [vmem:[#allocation2 + $0x50] sm:$0xff] %v247_v18 }
 0x183   :  { %v241_v21 = vmax.f32 %v202_v20, 0.0 }
 0x185   :  { %257 = vst [vmem:[#allocation2 + $0x20] sm:$0xff] %v241_v21  ;;  %v222_v22 = vpop.f32.mrf.mxu2 }
 0x186   :  { %v223_v23 = vadd.f32 %v529_v52, %v222_v22 }
 0x188   :  { %v248_v24 = vmax.f32 %v223_v23, 0.0  ;;  %v204_v25 = vpop.f32.mrf.mxu1 }
 0x189   :  { %v205_v26 = vadd.f32 %v529_v52, %v204_v25 }
 0x18a   :  { %264 = vst [vmem:[#allocation2 + $0x58] sm:$0xff] %v248_v24 }
 0x18b   :  { %v242_v27 = vmax.f32 %v205_v26, 0.0 }
 0x18d   :  { %258 = vst [vmem:[#allocation2 + $0x28] sm:$0xff] %v242_v27  ;;  %v225_v28 = vpop.f32.mrf.mxu2 }
 0x18e   :  { %v226_v29 = vadd.f32 %v529_v52, %v225_v28 }
 0x190   :  { %v249_v30 = vmax.f32 %v226_v29, 0.0  ;;  %v207_v31 = vpop.f32.mrf.mxu1 }
 0x191   :  { %v208_v32 = vadd.f32 %v529_v52, %v207_v31 }
 0x192   :  { %265 = vst [vmem:[#allocation2 + $0x60] sm:$0xff] %v249_v30 }
 0x193   :  { %v243_v33 = vmax.f32 %v208_v32, 0.0 }
 0x195   :  { %259 = vst [vmem:[#allocation2 + $0x30] sm:$0xff] %v243_v33  ;;  %v228_v34 = vpop.f32.mrf.mxu2 }
 0x196   :  { %v229_v35 = vadd.f32 %v529_v52, %v228_v34 }
 0x198   :  { %v250_v36 = vmax.f32 %v229_v35, 0.0 }
 0x19a   :  { %266 = vst [vmem:[#allocation2 + $0x68] sm:$0xff] %v250_v36 }
 0x19b   :  { %281 = dma.vmem_to_hbm [thread:$0]  %s274_s3, 2048, %s276_s8, [#allocation3], %s370_s9, %s370_s9, %s371_s10  }
 0x19c   :  { %367 = dma.done.wait [#allocation3], 2048  }
 0x19d   :  { %368 = vsyncadd [#allocation3], 4294965248 }
 0x19e   :  { %286 = vsyncpa [#allocation3], 1 }

</bundles_post_ra>
